<compile_context>
chip_gen: v5e
topology: v5e:2x2
jax: 0.10.0
libtpu: 0.0.40
codegen_flags: <defaults>
</compile_context>

<pallas_src>
import functools

import jax
import jax.numpy as jnp
from jax.experimental import pallas as pl
from jax.experimental.pallas import tpu as pltpu


LANE = 128
SUBLANE = 8
MAX_TM = 512


def _round_up(n, m):
    return ((n + m - 1) // m) * m


def _make_mlp_stack_kernel(num_layers, relu_flags):
    """Kernel over one batch tile: all layers applied back-to-back in VMEM."""

    def kernel(*refs):
        x_ref = refs[0]
        o_ref = refs[-1]
        params = refs[1:-1]  # interleaved (w0, b0, w1, b1, ...)

        h = x_ref[...]
        for l in range(num_layers):  # static unroll; activation stays on-chip
            w_ref = params[2 * l]
            b_ref = params[2 * l + 1]
            y = jnp.dot(h.astype(w_ref.dtype), w_ref[...],
                        preferred_element_type=jnp.float32)   # MXU, f32 accum
            y = y + b_ref[...].astype(jnp.float32)            # f32 epilogue
            if relu_flags[l]:
                y = jnp.maximum(y, 0.0)
            h = y
        o_ref[...] = h.astype(o_ref.dtype)

    return kernel


def _mlp_stack_forward_impl(x, flat_params, *, relu_flags, out_dim, tm):
    """x: (B, D_in) unpadded.  flat_params: (w0, b0, w1, b1, ...) padded."""
    B, d_in = x.shape
    num_layers = len(flat_params) // 2
    weights_padded = flat_params[0::2]
    biases_padded = flat_params[1::2]
    din_pad = weights_padded[0].shape[0]
    dout_pad = weights_padded[-1].shape[1]

    b_pad = _round_up(B, tm)

    # Zero-pad the activation once (padded lanes stay exactly zero through the
    # stack because the padded weight rows/cols and biases are zero).
    xp = jnp.zeros((b_pad, din_pad), x.dtype).at[:B, :d_in].set(x)

    grid = (b_pad // tm,)

    in_specs = [pl.BlockSpec((tm, din_pad), lambda i: (i, 0))]  # streamed tile
    for w, b in zip(weights_padded, biases_padded):
        kp, np_ = w.shape
        # Grid-invariant: weight/bias DMA'd once, resident across batch tiles.
        in_specs.append(pl.BlockSpec((kp, np_), lambda i: (0, 0)))
        in_specs.append(pl.BlockSpec((1, np_), lambda i: (0, 0)))

    out_specs = pl.BlockSpec((tm, dout_pad), lambda i: (i, 0))

    kernel = _make_mlp_stack_kernel(num_layers, tuple(relu_flags))

    out_padded = pl.pallas_call(
        kernel,
        out_shape=jax.ShapeDtypeStruct((b_pad, dout_pad), x.dtype),
        grid_spec=pltpu.PrefetchScalarGridSpec(
            num_scalar_prefetch=0,
            grid=grid,
            in_specs=in_specs,
            out_specs=out_specs,
        ),
        compiler_params=pltpu.CompilerParams(
            dimension_semantics=("parallel",)),   # batch tiles are independent
    )(xp, *flat_params)

    return out_padded[:B, :out_dim]


def mlp_stack_forward(x, weights_padded, biases_padded, *, relu_flags, out_dim,
                      tm=None):
    B = x.shape[0]
    if tm is None:
        b8 = _round_up(B, SUBLANE)
        tm = b8 if b8 <= MAX_TM else MAX_TM   # single tile for small batches

    flat_params = tuple(a for wb in zip(weights_padded, biases_padded) for a in wb)
    fwd = jax.jit(functools.partial(
        _mlp_stack_forward_impl,
        relu_flags=tuple(relu_flags), out_dim=out_dim, tm=tm))
    return fwd(x, flat_params)


# ------------------------- parameter construction ---------------------------

def xavier_normal(key, fan_in, fan_out, dtype=jnp.float32):
    # Stored directly in (D_in, D_out) layout — Gaussian init is
    # layout-symmetric, so no transpose is ever needed (init or per call).
    std = (2.0 / (fan_in + fan_out)) ** 0.5
    return (std * jax.random.normal(key, (fan_in, fan_out), jnp.float32)).astype(dtype)


def init_mlp_stack_params(key, input_dim, hidden_dim, output_dim, num_layers,
                          dtype=jnp.float32):
    """Mirrors MLPStack.__init__/init_weights with default flags.
    Returns (unpadded weights/biases, padded weights/biases, relu_flags)."""
    n_mlps = max(2, num_layers)
    dims = [input_dim] + [hidden_dim] * (n_mlps - 1) + [output_dim]
    relu_flags = [True] * (n_mlps - 1) + [False]      # final MLP has _ReLU=False

    keys = jax.random.split(key, n_mlps)
    weights, biases = [], []
    weights_p, biases_p = [], []
    for l in range(n_mlps):
        k_in, k_out = dims[l], dims[l + 1]
        w = xavier_normal(keys[l], k_in, k_out, dtype)          # (D_in, D_out)
        b = jnp.zeros((k_out,), dtype)                          # bias filled with 0
        weights.append(w)
        biases.append(b)

        kp, np_ = _round_up(k_in, LANE), _round_up(k_out, LANE)
        wp = jnp.zeros((kp, np_), dtype).at[:k_in, :k_out].set(w)
        bp = jnp.zeros((1, np_), dtype).at[0, :k_out].set(b)
        weights_p.append(wp)
        biases_p.append(bp)

    return weights, biases, weights_p, biases_p, relu_flags


def reference_forward(x, weights, biases, relu_flags):
    h = x.astype(jnp.float32)
    for w, b, r in zip(weights, biases, relu_flags):
        h = h @ w.astype(jnp.float32) + b.astype(jnp.float32)
        if r:
            h = jnp.maximum(h, 0.0)
    return h


if __name__ == "__main__":
    # Small shapes consistent with the module: MLPStack(32, 64, 48, num_layers=3)
    # applied to a (16, 32) batch.
    B, D_IN, D_HID, D_OUT, NUM_LAYERS = 16, 32, 64, 48, 3

    key = jax.random.PRNGKey(0)
    k_x, k_p = jax.random.split(key)
    x = jax.random.normal(k_x, (B, D_IN), dtype=jnp.float32)

    (weights, biases, weights_p, biases_p,
     relu_flags) = init_mlp_stack_params(k_p, D_IN, D_HID, D_OUT, NUM_LAYERS)

    # --- f32 path (strict correctness) ---
    out = mlp_stack_forward(x, weights_p, biases_p,
                            relu_flags=relu_flags, out_dim=D_OUT)
    out = jax.block_until_ready(out)
    ref = reference_forward(x, weights, biases, relu_flags)
    assert out.shape == (B, D_OUT)
    assert jnp.allclose(out, ref, atol=1e-5, rtol=1e-5), "f32 mismatch"

    # --- bf16 operand path (v6e/v7x guidance): bf16 inputs/weights, f32 accum ---
    x_bf = x.astype(jnp.bfloat16)
    w_bf = [w.astype(jnp.bfloat16) for w in weights_p]
    b_bf = [b.astype(jnp.bfloat16) for b in biases_p]
    out_bf = mlp_stack_forward(x_bf, w_bf, b_bf,
                               relu_flags=relu_flags, out_dim=D_OUT)
    out_bf = jax.block_until_ready(out_bf)
    assert jnp.allclose(out_bf.astype(jnp.float32), ref, atol=1e-1, rtol=1e-1), \
        "bf16 mismatch"

    # --- larger-batch path to exercise the multi-tile "parallel" grid ---
    B2 = 1100
    x2 = jax.random.normal(jax.random.PRNGKey(1), (B2, D_IN), dtype=jnp.float32)
    out2 = mlp_stack_forward(x2, weights_p, biases_p,
                             relu_flags=relu_flags, out_dim=D_OUT)
    out2 = jax.block_until_ready(out2)
    ref2 = reference_forward(x2, weights, biases, relu_flags)
    assert out2.shape == (B2, D_OUT)
    assert jnp.allclose(out2, ref2, atol=1e-5, rtol=1e-5), "f32 large-batch mismatch"

    print("KERNEL_OK")
</pallas_src>

<mosaic_0001>
module attributes {stable_mosaic.version = 11 : i64} {
  func.func @kernel(%arg0: i32, %arg1: memref<16x128xf32, #tpu.memory_space<vmem>>, %arg2: memref<128x128xf32, #tpu.memory_space<vmem>>, %arg3: memref<1x128xf32, #tpu.memory_space<vmem>>, %arg4: memref<128x128xf32, #tpu.memory_space<vmem>>, %arg5: memref<1x128xf32, #tpu.memory_space<vmem>>, %arg6: memref<128x128xf32, #tpu.memory_space<vmem>>, %arg7: memref<1x128xf32, #tpu.memory_space<vmem>>, %arg8: memref<16x128xf32, #tpu.memory_space<vmem>>) attributes {dimension_semantics = [#tpu.dimension_semantics<parallel>], iteration_bounds = array<i64: 1>, scalar_prefetch = 0 : i64, scratch_operands = 0 : i64, tpu.core_type = #tpu.core_type<tc>, window_params = [{transform_indices = @transform_0, window_bounds = array<i64: 16, 128>}, {pipeline_mode = #tpu.pipeline_mode<synchronous>, transform_indices = @transform_1, window_bounds = array<i64: 128, 128>}, {pipeline_mode = #tpu.pipeline_mode<synchronous>, transform_indices = @transform_2, window_bounds = array<i64: 1, 128>}, {pipeline_mode = #tpu.pipeline_mode<synchronous>, transform_indices = @transform_3, window_bounds = array<i64: 128, 128>}, {pipeline_mode = #tpu.pipeline_mode<synchronous>, transform_indices = @transform_4, window_bounds = array<i64: 1, 128>}, {pipeline_mode = #tpu.pipeline_mode<synchronous>, transform_indices = @transform_5, window_bounds = array<i64: 128, 128>}, {pipeline_mode = #tpu.pipeline_mode<synchronous>, transform_indices = @transform_6, window_bounds = array<i64: 1, 128>}, {transform_indices = @transform_7, window_bounds = array<i64: 16, 128>}]} {
    %c0 = arith.constant 0 : index
    %c0_0 = arith.constant 0 : index
    %0 = vector.load %arg1[%c0, %c0_0] : memref<16x128xf32, #tpu.memory_space<vmem>>, vector<16x128xf32>
    %c0_1 = arith.constant 0 : index
    %c0_2 = arith.constant 0 : index
    %1 = vector.load %arg2[%c0_1, %c0_2] : memref<128x128xf32, #tpu.memory_space<vmem>>, vector<128x128xf32>
    %cst = arith.constant dense<0.000000e+00> : vector<16x128xf32>
    %2 = tpu.matmul %0, %1, %cst {dimension_numbers = #tpu.dot_dimension_numbers<[1], [0], [0], [1], [0, 0, 1, 1], [], []>} : vector<16x128xf32>, vector<128x128xf32>, vector<16x128xf32> -> vector<16x128xf32>
    %c0_3 = arith.constant 0 : index
    %c0_4 = arith.constant 0 : index
    %3 = vector.load %arg3[%c0_3, %c0_4] : memref<1x128xf32, #tpu.memory_space<vmem>>, vector<1x128xf32>
    %4 = vector.broadcast %3 : vector<1x128xf32> to vector<16x128xf32>
    %5 = arith.addf %2, %4 : vector<16x128xf32>
    %cst_5 = arith.constant 0.000000e+00 : f32
    %6 = vector.broadcast %cst_5 : f32 to vector<16x128xf32>
    %7 = arith.maximumf %5, %6 : vector<16x128xf32>
    %c0_6 = arith.constant 0 : index
    %c0_7 = arith.constant 0 : index
    %8 = vector.load %arg4[%c0_6, %c0_7] : memref<128x128xf32, #tpu.memory_space<vmem>>, vector<128x128xf32>
    %cst_8 = arith.constant dense<0.000000e+00> : vector<16x128xf32>
    %9 = tpu.matmul %7, %8, %cst_8 {dimension_numbers = #tpu.dot_dimension_numbers<[1], [0], [0], [1], [0, 0, 1, 1], [], []>} : vector<16x128xf32>, vector<128x128xf32>, vector<16x128xf32> -> vector<16x128xf32>
    %c0_9 = arith.constant 0 : index
    %c0_10 = arith.constant 0 : index
    %10 = vector.load %arg5[%c0_9, %c0_10] : memref<1x128xf32, #tpu.memory_space<vmem>>, vector<1x128xf32>
    %11 = vector.broadcast %10 : vector<1x128xf32> to vector<16x128xf32>
    %12 = arith.addf %9, %11 : vector<16x128xf32>
    %cst_11 = arith.constant 0.000000e+00 : f32
    %13 = vector.broadcast %cst_11 : f32 to vector<16x128xf32>
    %14 = arith.maximumf %12, %13 : vector<16x128xf32>
    %c0_12 = arith.constant 0 : index
    %c0_13 = arith.constant 0 : index
    %15 = vector.load %arg6[%c0_12, %c0_13] : memref<128x128xf32, #tpu.memory_space<vmem>>, vector<128x128xf32>
    %cst_14 = arith.constant dense<0.000000e+00> : vector<16x128xf32>
    %16 = tpu.matmul %14, %15, %cst_14 {dimension_numbers = #tpu.dot_dimension_numbers<[1], [0], [0], [1], [0, 0, 1, 1], [], []>} : vector<16x128xf32>, vector<128x128xf32>, vector<16x128xf32> -> vector<16x128xf32>
    %c0_15 = arith.constant 0 : index
    %c0_16 = arith.constant 0 : index
    %17 = vector.load %arg7[%c0_15, %c0_16] : memref<1x128xf32, #tpu.memory_space<vmem>>, vector<1x128xf32>
    %18 = vector.broadcast %17 : vector<1x128xf32> to vector<16x128xf32>
    %19 = arith.addf %16, %18 : vector<16x128xf32>
    %c0_17 = arith.constant 0 : index
    %c0_18 = arith.constant 0 : index
    %20 = vector.load %arg8[%c0_17, %c0_18] : memref<16x128xf32, #tpu.memory_space<vmem>>, vector<16x128xf32>
    tpu.vector_store %arg8[%c0_17, %c0_18], %19 {strides = array<i32>} : memref<16x128xf32, #tpu.memory_space<vmem>>, vector<16x128xf32>,
    return
  }
  func.func @transform_0(%arg0: i32) -> (i32, i32) {
    %c0_i32 = arith.constant 0 : i32
    %c0_i32_0 = arith.constant 0 : i32
    return %arg0, %c0_i32 : i32, i32
  }
  func.func @transform_1(%arg0: i32) -> (i32, i32) {
    %c0_i32 = arith.constant 0 : i32
    %c0_i32_0 = arith.constant 0 : i32
    %c0_i32_1 = arith.constant 0 : i32
    return %c0_i32, %c0_i32_0 : i32, i32
  }
  func.func @transform_2(%arg0: i32) -> (i32, i32) {
    %c0_i32 = arith.constant 0 : i32
    %c0_i32_0 = arith.constant 0 : i32
    %c0_i32_1 = arith.constant 0 : i32
    return %c0_i32, %c0_i32_0 : i32, i32
  }
  func.func @transform_3(%arg0: i32) -> (i32, i32) {
    %c0_i32 = arith.constant 0 : i32
    %c0_i32_0 = arith.constant 0 : i32
    %c0_i32_1 = arith.constant 0 : i32
    return %c0_i32, %c0_i32_0 : i32, i32
  }
  func.func @transform_4(%arg0: i32) -> (i32, i32) {
    %c0_i32 = arith.constant 0 : i32
    %c0_i32_0 = arith.constant 0 : i32
    %c0_i32_1 = arith.constant 0 : i32
    return %c0_i32, %c0_i32_0 : i32, i32
  }
  func.func @transform_5(%arg0: i32) -> (i32, i32) {
    %c0_i32 = arith.constant 0 : i32
    %c0_i32_0 = arith.constant 0 : i32
    %c0_i32_1 = arith.constant 0 : i32
    return %c0_i32, %c0_i32_0 : i32, i32
  }
  func.func @transform_6(%arg0: i32) -> (i32, i32) {
    %c0_i32 = arith.constant 0 : i32
    %c0_i32_0 = arith.constant 0 : i32
    %c0_i32_1 = arith.constant 0 : i32
    return %c0_i32, %c0_i32_0 : i32, i32
  }
  func.func @transform_7(%arg0: i32) -> (i32, i32) {
    %c0_i32 = arith.constant 0 : i32
    %c0_i32_0 = arith.constant 0 : i32
    return %arg0, %c0_i32 : i32, i32
  }
}

</mosaic_0001>

<bundles_post_ra>
// kernel: _mlp_stack_forward_impl.1
= control target key start
LH: loop header
LB: loop body
LE: loop exit
PB: predicated region body
PF: predicated region fallthrough
CT: control target
= control target key end

     0   :  { %12 = vsyncpa [#allocation3], 0  ;;  %s443_s0 = inlined_call_operand.vmem [shape: f32[16,128], index: 0, kind: input, shape index: {}]   ;;  %s444_s1 = inlined_call_operand.hbm [shape: f32[128,128], index: 1, kind: input, shape index: {}]   ;;  %s445_s2 = inlined_call_operand.vmem [shape: f32[1,128], index: 2, kind: input, shape index: {}]   ;;  %s446_s3 = inlined_call_operand.hbm [shape: f32[128,128], index: 3, kind: input, shape index: {}]   ;;  %s447_s4 = inlined_call_operand.vmem [shape: f32[1,128], index: 4, kind: input, shape index: {}]   ;;  %s448_s5 = inlined_call_operand.hbm [shape: f32[128,128], index: 5, kind: input, shape index: {}]   ;;  %s449_s6 = inlined_call_operand.vmem [shape: f32[1,128], index: 6, kind: input, shape index: {}]   ;;  %s450_s7 = inlined_call_operand.hbm [shape: f32[16,128], index: 7, kind: output, shape index: {}]  }
   0x1   :  { %13 = vsyncpa [#allocation6], 0 }
   0x2   :  { %14 = vsyncpa [#allocation4], 0  ;;  %s36_s26 = sshll.u32 %s446_s3, 4  ;;  %s358_s27 = smov [#allocation5]   ;;  %s37_s26 = int_to_ptr.hbm [resolvable:$true] %s36_s26 }
   0x3   :  { %s38_s28 = sshll.u32 %s358_s27, 4  ;;  %s21_s8 = sshll.u32 %s444_s1, 4  ;;  %s39_s28 = int_to_ptr.vmem [resolvable:$true] %s38_s28  ;;  %s22_s8 = int_to_ptr.hbm [resolvable:$true] %s21_s8 }
   0x4   :  { %s359_s9 = smov 128   ;;  %s360_s10 = smov 8  }
   0x5   :  { %44 = dma.hbm_to_vmem [thread:$0]  %s37_s26, 2048, %s39_s28, [#allocation6], %s359_s9, %s359_s9, %s360_s10  }
   0x6   :  { %s361_s11 = smov [#allocation2]   ;;  %s51_s3 = sshll.u32 %s448_s5, 4  ;;  %s52_s3 = int_to_ptr.hbm [resolvable:$true] %s51_s3 }
   0x7   :  { %s23_s12 = sshll.u32 %s361_s11, 4  ;;  %s362_s1 = smov [#allocation7]   ;;  %s24_s12 = int_to_ptr.vmem [resolvable:$true] %s23_s12 }
   0x8   :  { %29 = dma.hbm_to_vmem [thread:$0]  %s22_s8, 2048, %s24_s12, [#allocation3], %s359_s9, %s359_s9, %s360_s10  }
   0x9   :  { %s53_s15 = sshll.u32 %s362_s1, 4  ;;  %s54_s15 = int_to_ptr.vmem [resolvable:$true] %s53_s15 }
   0xa   :  { %59 = dma.hbm_to_vmem [thread:$0]  %s52_s3, 2048, %s54_s15, [#allocation6], %s359_s9, %s359_s9, %s360_s10  }
   0xb   :  { %352 = dma.done.wait [#allocation3], 2048  }
   0xc   :  { %353 = vsyncadd [#allocation3], 4294965248 }
   0xd   :  { %354 = dma.done.wait [#allocation6], 4096  }
   0xe   :  { %355 = vsyncadd [#allocation6], 4294963200  ;;  %v91_v0 = vld [vmem:[#allocation2 + $0x78] sm:$0xff]  ;;  %v90_v1 = vld [vmem:[#allocation2 + $0x70] sm:$0xff]  ;;  %s363_s23 = smov [#allocation8]  }
   0xf   :  { %96 = vmatpush.msra.mxu0 %v91_v0  ;;  %231 = vmatpush.msra.mxu3 %v91_v0  ;;  %v89_v2 = vld [vmem:[#allocation2 + $0x68] sm:$0xff]  ;;  %v88_v3 = vld [vmem:[#allocation2 + $0x60] sm:$0xff]  ;;  %v87_v4 = vld [vmem:[#allocation2 + $0x58] sm:$0xff]  ;;  %s215_s24 = sshll.u32 %s363_s23, 4  ;;  %s216_s24 = int_to_ptr.vmem [resolvable:$true] %s215_s24 }
  0x10   :  { %v136_v5 = vld [vmem:[#allocation5 + $0x78] sm:$0xff]  ;;  %v135_v6 = vld [vmem:[#allocation5 + $0x70] sm:$0xff]  ;;  %v134_v8 = vld [vmem:[#allocation5 + $0x68] sm:$0xff] }
  0x11   :  { %97 = vmatpush.msra.mxu0 %v90_v1  ;;  %232 = vmatpush.msra.mxu3 %v90_v1  ;;  %v86_v7 = vld [vmem:[#allocation2 + $0x50] sm:$0xff]  ;;  %v85_v9 = vld [vmem:[#allocation2 + $0x48] sm:$0xff]  ;;  %v133_v10 = vld [vmem:[#allocation5 + $0x60] sm:$0xff] }
  0x12   :  { %141 = vmatpush.msra.mxu1 %v136_v5  ;;  %v84_v11 = vld [vmem:[#allocation2 + $0x40] sm:$0xff]  ;;  %v132_v12 = vld [vmem:[#allocation5 + $0x58] sm:$0xff]  ;;  %v131_v14 = vld [vmem:[#allocation5 + $0x50] sm:$0xff] }
  0x13   :  { %98 = vmatpush.msra.mxu0 %v89_v2  ;;  %233 = vmatpush.msra.mxu3 %v89_v2  ;;  %v83_v13 = vld [vmem:[#allocation2 + $0x38] sm:$0xff]  ;;  %v82_v15 = vld [vmem:[#allocation2 + $0x30] sm:$0xff]  ;;  %v130_v16 = vld [vmem:[#allocation5 + $0x48] sm:$0xff] }
  0x14   :  { %142 = vmatpush.msra.mxu1 %v135_v6  ;;  %v81_v17 = vld [vmem:[#allocation2 + $0x28] sm:$0xff]  ;;  %v129_v18 = vld [vmem:[#allocation5 + $0x40] sm:$0xff]  ;;  %v128_v20 = vld [vmem:[#allocation5 + $0x38] sm:$0xff] }
  0x15   :  { %99 = vmatpush.msra.mxu0 %v88_v3  ;;  %234 = vmatpush.msra.mxu3 %v88_v3  ;;  %v80_v19 = vld [vmem:[#allocation2 + $0x20] sm:$0xff]  ;;  %v79_v21 = vld [vmem:[#allocation2 + $0x18] sm:$0xff]  ;;  %v127_v22 = vld [vmem:[#allocation5 + $0x30] sm:$0xff] }
  0x16   :  { %143 = vmatpush.msra.mxu1 %v134_v8  ;;  %v78_v23 = vld [vmem:[#allocation2 + $0x10] sm:$0xff]  ;;  %v126_v24 = vld [vmem:[#allocation5 + $0x28] sm:$0xff]  ;;  %v125_v26 = vld [vmem:[#allocation5 + $0x20] sm:$0xff] }
  0x17   :  { %100 = vmatpush.msra.mxu0 %v87_v4  ;;  %235 = vmatpush.msra.mxu3 %v87_v4  ;;  %v77_v25 = vld [vmem:[#allocation2 + $0x8] sm:$0xff]  ;;  %v76_v27 = vld [vmem:[#allocation2] sm:$0xff]  ;;  %v124_v30 = vld [vmem:[#allocation5 + $0x18] sm:$0xff] }
  0x18   :  { %144 = vmatpush.msra.mxu1 %v133_v10  ;;  %v74_v28 = vld [vmem:[%s443_s0] sm:$0xff]  ;;  %v75_v29 = vld [vmem:[%s443_s0 + $0x8] sm:$0xff]  ;;  %v123_v31 = vld [vmem:[#allocation5 + $0x10] sm:$0xff] }
  0x19   :  { %101 = vmatpush.msra.mxu0 %v86_v7  ;;  %236 = vmatpush.msra.mxu3 %v86_v7  ;;  %v122_v32 = vld [vmem:[#allocation5 + $0x8] sm:$0xff]  ;;  %v121_v33 = vld [vmem:[#allocation5] sm:$0xff]  ;;  %v181_v34 = vld [vmem:[#allocation7 + $0x78] sm:$0xff] }
  0x1a   :  { %145 = vmatpush.msra.mxu1 %v132_v12  ;;  %v180_v35 = vld [vmem:[#allocation7 + $0x70] sm:$0xff]  ;;  %186 = vmatpush.msra.mxu2 %v181_v34  ;;  %v179_v36 = vld [vmem:[#allocation7 + $0x68] sm:$0xff]  ;;  %v178_v37 = vld [vmem:[#allocation7 + $0x60] sm:$0xff] }
  0x1b   :  { %102 = vmatpush.msra.mxu0 %v85_v9  ;;  %237 = vmatpush.msra.mxu3 %v85_v9  ;;  %v177_v38 = vld [vmem:[#allocation7 + $0x58] sm:$0xff]  ;;  %v176_v39 = vld [vmem:[#allocation7 + $0x50] sm:$0xff]  ;;  %v175_v40 = vld [vmem:[#allocation7 + $0x48] sm:$0xff] }
  0x1c   :  { %146 = vmatpush.msra.mxu1 %v131_v14  ;;  %187 = vmatpush.msra.mxu2 %v180_v35  ;;  %v174_v41 = vld [vmem:[#allocation7 + $0x40] sm:$0xff]  ;;  %v173_v42 = vld [vmem:[#allocation7 + $0x38] sm:$0xff]  ;;  %v172_v44 = vld [vmem:[#allocation7 + $0x30] sm:$0xff] }
  0x1d   :  { %103 = vmatpush.msra.mxu0 %v84_v11  ;;  %238 = vmatpush.msra.mxu3 %v84_v11  ;;  %v253_v43 = vld [vmem:[%s445_s2] ss:$0 sm:$0xff]  ;;  %v171_v45 = vld [vmem:[#allocation7 + $0x28] sm:$0xff]  ;;  %v169_v50 = vld [vmem:[#allocation7 + $0x18] sm:$0xff] }
  0x1e   :  { %147 = vmatpush.msra.mxu1 %v130_v16  ;;  %188 = vmatpush.msra.mxu2 %v179_v36  ;;  %v170_v48 = vld [vmem:[#allocation7 + $0x20] sm:$0xff]  ;;  %v168_v54 = vld [vmem:[#allocation7 + $0x10] sm:$0xff]  ;;  %v167_v55 = vld [vmem:[#allocation7 + $0x8] sm:$0xff] }
  0x1f   :  { %104 = vmatpush.msra.mxu0 %v83_v13  ;;  %239 = vmatpush.msra.mxu3 %v83_v13  ;;  %v166_v56 = vld [vmem:[#allocation7] sm:$0xff] }
  0x20   :  { %148 = vmatpush.msra.mxu1 %v129_v18  ;;  %189 = vmatpush.msra.mxu2 %v178_v37  ;;  %v254_v57 = vld [vmem:[%s447_s4] ss:$0 sm:$0xff]  ;;  %s217_s4 = sshll.u32 %s450_s7, 4  ;;  %s218_s4 = int_to_ptr.hbm [resolvable:$true] %s217_s4 }
  0x21   :  { %105 = vmatpush.msra.mxu0 %v82_v15  ;;  %240 = vmatpush.msra.mxu3 %v82_v15  ;;  %v255_v0 = vld [vmem:[%s449_s6] ss:$0 sm:$0xff] }
  0x22   :  { %149 = vmatpush.msra.mxu1 %v128_v20  ;;  %190 = vmatpush.msra.mxu2 %v177_v38 }
  0x23   :  { %106 = vmatpush.msra.mxu0 %v81_v17  ;;  %241 = vmatpush.msra.mxu3 %v81_v17 }
  0x24   :  { %150 = vmatpush.msra.mxu1 %v127_v22  ;;  %191 = vmatpush.msra.mxu2 %v176_v39 }
  0x25   :  { %107 = vmatpush.msra.mxu0 %v80_v19  ;;  %242 = vmatpush.msra.mxu3 %v80_v19 }
  0x26   :  { %151 = vmatpush.msra.mxu1 %v126_v24  ;;  %192 = vmatpush.msra.mxu2 %v175_v40 }
  0x27   :  { %108 = vmatpush.msra.mxu0 %v79_v21  ;;  %243 = vmatpush.msra.mxu3 %v79_v21 }
  0x28   :  { %152 = vmatpush.msra.mxu1 %v125_v26  ;;  %193 = vmatpush.msra.mxu2 %v174_v41 }
  0x29   :  { %109 = vmatpush.msra.mxu0 %v78_v23  ;;  %244 = vmatpush.msra.mxu3 %v78_v23 }
  0x2a   :  { %153 = vmatpush.msra.mxu1 %v124_v30  ;;  %194 = vmatpush.msra.mxu2 %v173_v42 }
  0x2b   :  { %110 = vmatpush.msra.mxu0 %v77_v25  ;;  %245 = vmatpush.msra.mxu3 %v77_v25 }
  0x2c   :  { %154 = vmatpush.msra.mxu1 %v123_v31  ;;  %195 = vmatpush.msra.mxu2 %v172_v44 }
  0x2d   :  { %111 = vmatpush.msra.mxu0 %v76_v27  ;;  %246 = vmatpush.msra.mxu3 %v76_v27 }
  0x2e   :  { %112 = vmatmul.f32.vlgmr.msra.gmra.mxu0 %v74_v28  ;;  %115 = vmatmul.f32.vlgmr.msra.gmra.mxu3 %v75_v29 }
  0x2f   :  { %155 = vmatpush.msra.mxu1 %v122_v32  ;;  %196 = vmatpush.msra.mxu2 %v171_v45 }
  0x31   :  { %156 = vmatpush.msra.mxu1 %v121_v33  ;;  %197 = vmatpush.msra.mxu2 %v170_v48 }
  0x33   :  { %198 = vmatpush.msra.mxu2 %v169_v50 }
  0x35   :  { %199 = vmatpush.msra.mxu2 %v168_v54 }
  0x37   :  { %200 = vmatpush.msra.mxu2 %v167_v55 }
  0x39   :  { %201 = vmatpush.msra.mxu2 %v166_v56 }
  0xab   :  { %v113_v46 = vpop.f32.mrf.mxu0 }
  0xac   :  { %v114_v47 = vadd.f32 %v253_v43, %v113_v46 }
  0xae   :  { %v119_v49 = vmax.f32 %v114_v47, 0.0 }
  0xb0   :  { %157 = vmatmul.f32.vlgmr.msra.gmra.mxu1 %v119_v49 }
  0xb1   :  { %v116_v51 = vpop.f32.mrf.mxu3 }
  0xb2   :  { %v117_v52 = vadd.f32 %v253_v43, %v116_v51 }
  0xb4   :  { %v120_v53 = vmax.f32 %v117_v52, 0.0 }
  0xb8   :  { %160 = vmatmul.f32.gmra.mxu1 %v120_v53 }
 0x12d   :  { %v158_v58 = vpop.f32.mrf.mxu1 }
 0x12e   :  { %v159_v59 = vadd.f32 %v254_v57, %v158_v58 }
 0x130   :  { %v164_v60 = vmax.f32 %v159_v59, 0.0 }
 0x132   :  { %202 = vmatmul.f32.vlgmr.msra.gmra.mxu2 %v164_v60 }
 0x135   :  { %v161_v61 = vpop.f32.mrf.mxu1 }
 0x136   :  { %v162_v62 = vadd.f32 %v254_v57, %v161_v61 }
 0x138   :  { %v165_v63 = vmax.f32 %v162_v62, 0.0 }
 0x13a   :  { %205 = vmatmul.f32.gmra.mxu2 %v165_v63 }
 0x1b5   :  { %v203_v1 = vpop.f32.mrf.mxu2 }
 0x1b6   :  { %v204_v2 = vadd.f32 %v255_v0, %v203_v1 }
 0x1b8   :  { %209 = vst [vmem:[#allocation8] sm:$0xff] %v204_v2 }
 0x1bd   :  { %v206_v3 = vpop.f32.mrf.mxu2 }
 0x1be   :  { %v207_v4 = vadd.f32 %v255_v0, %v206_v3 }
 0x1c0   :  { %210 = vst [vmem:[#allocation8 + $0x8] sm:$0xff] %v207_v4 }
 0x1c1   :  { %223 = dma.vmem_to_hbm [thread:$0]  %s216_s24, 256, %s218_s4, [#allocation4], %s359_s9, %s359_s9, %s360_s10  }
 0x1c2   :  { %356 = dma.done.wait [#allocation4], 256  }
 0x1c3   :  { %357 = vsyncadd [#allocation4], 4294967040 }
 0x1c4   :  { %228 = vsyncpa [#allocation3], 1 }
 0x1c5   :  { %229 = vsyncpa [#allocation6], 1 }
 0x1c6   :  { %230 = vsyncpa [#allocation4], 1 }

</bundles_post_ra>
